<compile_context>
chip_gen: v6e
topology: v6e:2x2x1
jax: 0.10.0
libtpu: 0.0.40
codegen_flags: <defaults>
</compile_context>

<pallas_src>
import math

import jax
import jax.numpy as jnp
from jax.experimental import pallas as pl
from jax.experimental.pallas import tpu as pltpu


HIDDEN = 128  # hidden width of the Adversary MLP (fixed by the module)


# ----------------------------------------------------------------------------
# Fused Pallas kernel: out = (relu(z @ W1 + b1)) @ W2p + b2p
# ----------------------------------------------------------------------------
def _adversary_kernel(z_ref, w1_ref, b1_ref, w2_ref, b2_ref, o_ref):
    h = jnp.dot(z_ref[...], w1_ref[...], preferred_element_type=jnp.float32)
    h = jnp.maximum(h + b1_ref[...], 0.0)
    out = jnp.dot(h, w2_ref[...], preferred_element_type=jnp.float32)
    o_ref[...] = (out + b2_ref[...]).astype(o_ref.dtype)


def _round_up(x, m):
    return ((x + m - 1) // m) * m


def adversary_forward(packed, z):
    """packed = (w1, b1, w2p, b2p); z: (N, z_dim) float32 -> (N, 1) float32."""
    w1, b1, w2p, b2p = packed
    M, K = z.shape
    assert w1.shape == (K, HIDDEN)

    # Pad the batch to a sublane-aligned size and tile it (scales to big batches;
    # trivial padding for small ones).
    Mp = _round_up(max(M, 8), 8)
    tm = min(Mp, 512)
    Mp = _round_up(Mp, tm)
    if Mp != M:
        z = jnp.pad(z, ((0, Mp - M), (0, 0)))

    out = pl.pallas_call(
        _adversary_kernel,
        out_shape=jax.ShapeDtypeStruct((Mp, HIDDEN), jnp.float32),
        grid=(Mp // tm,),
        in_specs=[
            pl.BlockSpec((tm, K), lambda i: (i, 0)),          # z rows
            pl.BlockSpec((K, HIDDEN), lambda i: (0, 0)),      # W1 (in, hidden)
            pl.BlockSpec((1, HIDDEN), lambda i: (0, 0)),      # b1
            pl.BlockSpec((HIDDEN, HIDDEN), lambda i: (0, 0)), # W2 padded to lane-dense
            pl.BlockSpec((1, HIDDEN), lambda i: (0, 0)),      # b2 padded
        ],
        out_specs=pl.BlockSpec((tm, HIDDEN), lambda i: (i, 0)),
        compiler_params=pltpu.CompilerParams(
            dimension_semantics=("parallel",),  # batch tiles are independent (v7x megacore)
        ),
    )(z, w1, b1, w2p, b2p)

    # Only column 0 of the padded output carries the real Linear(128, 1) result.
    return out[:M, :1]


# ----------------------------------------------------------------------------
# Parameters (PyTorch-default-style uniform init, PyTorch (out, in) layout)
# ----------------------------------------------------------------------------
def init_params(key, z_dim=20):
    def uni(k, shape, fan_in):
        bound = 1.0 / math.sqrt(fan_in)
        return jax.random.uniform(k, shape, jnp.float32, -bound, bound)

    k = jax.random.split(key, 4)
    return {
        "fc1_w": uni(k[0], (HIDDEN, z_dim), z_dim),   # (out, in) like nn.Linear
        "fc1_b": uni(k[1], (HIDDEN,), z_dim),
        "fc2_w": uni(k[2], (1, HIDDEN), HIDDEN),
        "fc2_b": uni(k[3], (1,), HIDDEN),
    }


def pack_params(params):
    """One-time packing: pre-transpose to (in, out) and pad layer 2 to lane-dense 128."""
    w1 = jnp.asarray(params["fc1_w"]).T                      # (z_dim, 128)
    b1 = jnp.asarray(params["fc1_b"]).reshape(1, HIDDEN)     # (1, 128)
    w2 = jnp.asarray(params["fc2_w"]).T                      # (128, 1)
    b2 = jnp.asarray(params["fc2_b"]).reshape(1, 1)          # (1, 1)
    w2p = jnp.pad(w2, ((0, 0), (0, HIDDEN - w2.shape[1])))   # (128, 128), zeros past col 0
    b2p = jnp.pad(b2, ((0, 0), (0, HIDDEN - b2.shape[1])))   # (1, 128)
    return w1, b1, w2p, b2p


# ----------------------------------------------------------------------------
if __name__ == "__main__":
    key = jax.random.PRNGKey(0)
    pkey, zkey = jax.random.split(key)

    z_dim = 20
    params = init_params(pkey, z_dim=z_dim)
    packed = pack_params(params)

    z = jax.random.normal(zkey, (2, z_dim), jnp.float32)

    out = adversary_forward(packed, z)
    jax.block_until_ready(out)
    assert out.shape == (2, 1)

    # Pure-JAX reference (PyTorch semantics: x @ W.T + b)
    h_ref = jnp.maximum(z @ params["fc1_w"].T + params["fc1_b"], 0.0)
    ref = h_ref @ params["fc2_w"].T + params["fc2_b"]
    assert jnp.allclose(out, ref, atol=1e-5, rtol=1e-5), "mismatch vs reference"

    print("KERNEL_OK")
</pallas_src>

<mosaic_0001>
module attributes {stable_mosaic.version = 11 : i64} {
  func.func @_adversary_kernel(%arg0: i32, %arg1: memref<8x20xf32, #tpu.memory_space<vmem>>, %arg2: memref<20x128xf32, #tpu.memory_space<vmem>>, %arg3: memref<1x128xf32, #tpu.memory_space<vmem>>, %arg4: memref<128x128xf32, #tpu.memory_space<vmem>>, %arg5: memref<1x128xf32, #tpu.memory_space<vmem>>, %arg6: memref<8x128xf32, #tpu.memory_space<vmem>>) attributes {dimension_semantics = [#tpu.dimension_semantics<parallel>], iteration_bounds = array<i64: 1>, scalar_prefetch = 0 : i64, scratch_operands = 0 : i64, tpu.core_type = #tpu.core_type<tc>, window_params = [{transform_indices = @transform_0, window_bounds = array<i64: 8, 20>}, {pipeline_mode = #tpu.pipeline_mode<synchronous>, transform_indices = @transform_1, window_bounds = array<i64: 20, 128>}, {pipeline_mode = #tpu.pipeline_mode<synchronous>, transform_indices = @transform_2, window_bounds = array<i64: 1, 128>}, {pipeline_mode = #tpu.pipeline_mode<synchronous>, transform_indices = @transform_3, window_bounds = array<i64: 128, 128>}, {pipeline_mode = #tpu.pipeline_mode<synchronous>, transform_indices = @transform_4, window_bounds = array<i64: 1, 128>}, {transform_indices = @transform_5, window_bounds = array<i64: 8, 128>}]} {
    %c0 = arith.constant 0 : index
    %c0_0 = arith.constant 0 : index
    %0 = vector.load %arg1[%c0, %c0_0] : memref<8x20xf32, #tpu.memory_space<vmem>>, vector<8x20xf32>
    %c0_1 = arith.constant 0 : index
    %c0_2 = arith.constant 0 : index
    %1 = vector.load %arg2[%c0_1, %c0_2] : memref<20x128xf32, #tpu.memory_space<vmem>>, vector<20x128xf32>
    %cst = arith.constant dense<0.000000e+00> : vector<8x128xf32>
    %2 = tpu.matmul %0, %1, %cst {dimension_numbers = #tpu.dot_dimension_numbers<[1], [0], [0], [1], [0, 0, 1, 1], [], []>} : vector<8x20xf32>, vector<20x128xf32>, vector<8x128xf32> -> vector<8x128xf32>
    %c0_3 = arith.constant 0 : index
    %c0_4 = arith.constant 0 : index
    %3 = vector.load %arg3[%c0_3, %c0_4] : memref<1x128xf32, #tpu.memory_space<vmem>>, vector<1x128xf32>
    %4 = vector.broadcast %3 : vector<1x128xf32> to vector<8x128xf32>
    %5 = arith.addf %2, %4 : vector<8x128xf32>
    %cst_5 = arith.constant 0.000000e+00 : f32
    %6 = vector.broadcast %cst_5 : f32 to vector<8x128xf32>
    %7 = arith.maximumf %5, %6 : vector<8x128xf32>
    %c0_6 = arith.constant 0 : index
    %c0_7 = arith.constant 0 : index
    %8 = vector.load %arg4[%c0_6, %c0_7] : memref<128x128xf32, #tpu.memory_space<vmem>>, vector<128x128xf32>
    %cst_8 = arith.constant dense<0.000000e+00> : vector<8x128xf32>
    %9 = tpu.matmul %7, %8, %cst_8 {dimension_numbers = #tpu.dot_dimension_numbers<[1], [0], [0], [1], [0, 0, 1, 1], [], []>} : vector<8x128xf32>, vector<128x128xf32>, vector<8x128xf32> -> vector<8x128xf32>
    %c0_9 = arith.constant 0 : index
    %c0_10 = arith.constant 0 : index
    %10 = vector.load %arg5[%c0_9, %c0_10] : memref<1x128xf32, #tpu.memory_space<vmem>>, vector<1x128xf32>
    %11 = vector.broadcast %10 : vector<1x128xf32> to vector<8x128xf32>
    %12 = arith.addf %9, %11 : vector<8x128xf32>
    %c0_11 = arith.constant 0 : index
    %c0_12 = arith.constant 0 : index
    %13 = vector.load %arg6[%c0_11, %c0_12] : memref<8x128xf32, #tpu.memory_space<vmem>>, vector<8x128xf32>
    tpu.vector_store %arg6[%c0_11, %c0_12], %12 {strides = array<i32>} : memref<8x128xf32, #tpu.memory_space<vmem>>, vector<8x128xf32>,
    return
  }
  func.func @transform_0(%arg0: i32) -> (i32, i32) {
    %c0_i32 = arith.constant 0 : i32
    %c0_i32_0 = arith.constant 0 : i32
    return %arg0, %c0_i32 : i32, i32
  }
  func.func @transform_1(%arg0: i32) -> (i32, i32) {
    %c0_i32 = arith.constant 0 : i32
    %c0_i32_0 = arith.constant 0 : i32
    %c0_i32_1 = arith.constant 0 : i32
    return %c0_i32, %c0_i32_0 : i32, i32
  }
  func.func @transform_2(%arg0: i32) -> (i32, i32) {
    %c0_i32 = arith.constant 0 : i32
    %c0_i32_0 = arith.constant 0 : i32
    %c0_i32_1 = arith.constant 0 : i32
    return %c0_i32, %c0_i32_0 : i32, i32
  }
  func.func @transform_3(%arg0: i32) -> (i32, i32) {
    %c0_i32 = arith.constant 0 : i32
    %c0_i32_0 = arith.constant 0 : i32
    %c0_i32_1 = arith.constant 0 : i32
    return %c0_i32, %c0_i32_0 : i32, i32
  }
  func.func @transform_4(%arg0: i32) -> (i32, i32) {
    %c0_i32 = arith.constant 0 : i32
    %c0_i32_0 = arith.constant 0 : i32
    %c0_i32_1 = arith.constant 0 : i32
    return %c0_i32, %c0_i32_0 : i32, i32
  }
  func.func @transform_5(%arg0: i32) -> (i32, i32) {
    %c0_i32 = arith.constant 0 : i32
    %c0_i32_0 = arith.constant 0 : i32
    return %arg0, %c0_i32 : i32, i32
  }
}

</mosaic_0001>

<bundles_post_ra>
// kernel: tpu_custom_call.1
= control target key start
LH: loop header
LB: loop body
LE: loop exit
PB: predicated region body
PF: predicated region fallthrough
CT: control target
= control target key end

     0   :  { %10 = vsyncpa [#allocation3], 0  ;;  %s479_s0 = inlined_call_operand.hbm [shape: f32[8,20], index: 0, kind: input, shape index: {}]   ;;  %s480_s1 = inlined_call_operand.hbm [shape: f32[20,128], index: 1, kind: input, shape index: {}]   ;;  %s481_s2 = inlined_call_operand.vmem [shape: f32[1,128], index: 2, kind: input, shape index: {}]   ;;  %s482_s3 = inlined_call_operand.hbm [shape: f32[128,128], index: 3, kind: input, shape index: {}]   ;;  %s483_s4 = inlined_call_operand.vmem [shape: f32[1,128], index: 4, kind: input, shape index: {}]   ;;  %s484_s5 = inlined_call_operand.hbm [shape: f32[8,128], index: 5, kind: output, shape index: {}]  }
   0x1   :  { %11 = vsyncpa [#allocation6], 0 }
   0x2   :  { %12 = vsyncpa [#allocation4], 0  ;;  %s423_s18 = smov [#allocation5]  }
   0x3   :  { %s28_s19 = sshll.u32 %s423_s18, 4  ;;  %s29_s19 = int_to_ptr.vmem [resolvable:$true] %s28_s19 }
   0x4   :  { %s345_s20 = scalar_lea.vmem %s29_s19, 384  ;;  %p350_p1 = scmp.lt.s32.totalorder %s29_s19, %s29_s19 }
   0x5   :  { %p346_p0 = scmp.ne.s32.totalorder %s29_s19, %s345_s20  ;;  %p351_p2 = scmp.lt.s32.totalorder %s345_s20, %s345_s20 }
   0x7   :  { %p352_p3 = por %p351_p2, %p350_p1 }
   0x9   :  { %p353_p4 = pnand %p352_p3, %p346_p0 }
   0xb   :  { %356 = shalt.err (!%p353_p4)
}
   0xc   :  { %s424_s21 = smov 128   ;;  %s425_s22 = smov 8  }
   0xd   :  { %34 = dma.hbm_to_vmem [thread:$0]  %s480_s1, 384, %s29_s19, [#allocation6], %s424_s21, %s424_s21, %s425_s22  }
   0xe   :  { %s426_s25 = smov [#allocation2]   ;;  %s427_s27 = smov [#allocation7]  }
   0xf   :  { %s19_s26 = sshll.u32 %s426_s25, 4  ;;  %s42_s28 = sshll.u32 %s427_s27, 4  ;;  %s20_s26 = int_to_ptr.vmem [resolvable:$true] %s19_s26  ;;  %s43_s28 = int_to_ptr.vmem [resolvable:$true] %s42_s28 }
  0x10   :  { %s365_s29 = scalar_lea.vmem %s20_s26, 128  ;;  %p370_p6 = scmp.lt.s32.totalorder %s20_s26, %s20_s26 }
  0x11   :  { %p366_p5 = scmp.ne.s32.totalorder %s20_s26, %s365_s29  ;;  %p371_p7 = scmp.lt.s32.totalorder %s365_s29, %s365_s29 }
  0x13   :  { %p372_p8 = por %p371_p7, %p370_p6 }
  0x15   :  { %p373_p9 = pnand %p372_p8, %p366_p5 }
  0x17   :  { %376 = shalt.err (!%p373_p9)
}
  0x18   :  { %22 = dma.hbm_to_vmem [thread:$0]  %s479_s0, 128, %s20_s26, [#allocation3]  }
  0x19   :  { %s385_s7 = scalar_lea.vmem %s43_s28, 2048  ;;  %p390_p11 = scmp.lt.s32.totalorder %s43_s28, %s43_s28 }
  0x1a   :  { %p386_p10 = scmp.ne.s32.totalorder %s43_s28, %s385_s7  ;;  %p391_p12 = scmp.lt.s32.totalorder %s385_s7, %s385_s7 }
  0x1c   :  { %p392_p13 = por %p391_p12, %p390_p11 }
  0x1e   :  { %p393_p0 = pnand %p392_p13, %p386_p10 }
  0x20   :  { %396 = shalt.err (!%p393_p0)
}
  0x21   :  { %48 = dma.hbm_to_vmem [thread:$0]  %s482_s3, 2048, %s43_s28, [#allocation6], %s424_s21, %s424_s21, %s425_s22  }
  0x22   :  { %417 = dma.done.wait [#allocation3], 128  }
  0x23   :  { %418 = vsyncadd [#allocation3], 4294967168 }
  0x24   :  { %419 = dma.done.wait [#allocation6], 2432  }
  0x25   :  { %420 = vsyncadd [#allocation6], 4294964864  ;;  %v428_v0 = vmov 0.0   ;;  %vm429_vm0 = vmmov 0   ;;  %vm75_vm1 = vcmask 1043456   ;;  %v62_v2 = vld [vmem:[#allocation5 + $0x8] sm:$0xff] }
  0x26   :  { %285 = vmatprep.subr.mxu0 %v428_v0  ;;  %291 = vmatprep.mubr.msk.f32.mxu0 %vm429_vm0, %v428_v0  ;;  %v63_v1 = vld [vmem:[#allocation5 + $0x10] sm:$0xf]  ;;  %v164_v4 = vld [vmem:[#allocation7 + $0x70] sm:$0xff]  ;;  %v61_v5 = vld [vmem:[#allocation5] sm:$0xff]  ;;  %vm71_vm2 = vcmask 162816   ;;  %s430_s11 = smov [#allocation8]  }
  0x27   :  { %294 = vmatprep.subr.mxu1 %v428_v0  ;;  %326 = vmatprep.mubr.msk.f32.mxu1 %vm429_vm0, %v428_v0  ;;  %v165_v3 = vld [vmem:[#allocation7 + $0x78] sm:$0xff]  ;;  %v60_v6 = vld [vmem:[#allocation2] sm:$0xff]  ;;  %v163_v7 = vld [vmem:[#allocation7 + $0x68] sm:$0xff]  ;;  %s250_s12 = sshll.u32 %s430_s11, 4  ;;  %s251_s12 = int_to_ptr.vmem [resolvable:$true] %s250_s12 }
  0x28   :  { %286 = vmatpush3.msk.msra.mxu0 %vm75_vm1, %v63_v1  ;;  %295 = vmatpush3.msra.mxu1 %v165_v3  ;;  %v162_v8 = vld [vmem:[#allocation7 + $0x60] sm:$0xff]  ;;  %v161_v9 = vld [vmem:[#allocation7 + $0x58] sm:$0xff]  ;;  %v160_v10 = vld [vmem:[#allocation7 + $0x50] sm:$0xff]  ;;  %s397_s13 = scalar_lea.vmem %s251_s12, 128  ;;  %p402_p2 = scmp.lt.s32.totalorder %s251_s12, %s251_s12 }
  0x29   :  { %287 = vmatprep.subr.mxu0 %v428_v0  ;;  %296 = vmatprep.subr.mxu1 %v428_v0  ;;  %v159_v11 = vld [vmem:[#allocation7 + $0x48] sm:$0xff]  ;;  %v158_v12 = vld [vmem:[#allocation7 + $0x40] sm:$0xff]  ;;  %v157_v13 = vld [vmem:[#allocation7 + $0x38] sm:$0xff]  ;;  %p398_p1 = scmp.ne.s32.totalorder %s251_s12, %s397_s13  ;;  %p403_p3 = scmp.lt.s32.totalorder %s397_s13, %s397_s13 }
  0x2a   :  { %288 = vmatpush3.msra.mxu0 %v62_v2  ;;  %297 = vmatpush3.msra.mxu1 %v164_v4  ;;  %v156_v14 = vld [vmem:[#allocation7 + $0x30] sm:$0xff]  ;;  %v155_v15 = vld [vmem:[#allocation7 + $0x28] sm:$0xff]  ;;  %v154_v16 = vld [vmem:[#allocation7 + $0x20] sm:$0xff] }
  0x2b   :  { %289 = vmatprep.subr.mxu0 %v428_v0  ;;  %298 = vmatprep.subr.mxu1 %v428_v0  ;;  %v153_v17 = vld [vmem:[#allocation7 + $0x18] sm:$0xff]  ;;  %v152_v18 = vld [vmem:[#allocation7 + $0x10] sm:$0xff]  ;;  %v151_v19 = vld [vmem:[#allocation7 + $0x8] sm:$0xff]  ;;  %p404_p4 = por %p403_p3, %p402_p2 }
  0x2c   :  { %290 = vmatpush3.msra.mxu0 %v61_v5  ;;  %299 = vmatpush3.msra.mxu1 %v163_v7  ;;  %v150_v20 = vld [vmem:[#allocation7] sm:$0xff] }
  0x2d   :  { %292 = vmatmul.mubr.msk.f32.vlgmr.msra.gmra.mxu0 %vm71_vm2, %v60_v6  ;;  %300 = vmatprep.subr.mxu1 %v428_v0  ;;  %v260_v21 = vld [vmem:[%s481_s2] ss:$0 sm:$0xff]  ;;  %p405_p5 = pnand %p404_p4, %p398_p1 }
  0x2e   :  { %301 = vmatpush3.msra.mxu1 %v162_v8  ;;  %v263_v26 = vld [vmem:[%s483_s4] ss:$0 sm:$0xff] }
  0x2f   :  { %302 = vmatprep.subr.mxu1 %v428_v0 }
  0x30   :  { %303 = vmatpush3.msra.mxu1 %v161_v9 }
  0x31   :  { %304 = vmatprep.subr.mxu1 %v428_v0 }
  0x32   :  { %305 = vmatpush3.msra.mxu1 %v160_v10 }
  0x33   :  { %306 = vmatprep.subr.mxu1 %v428_v0 }
  0x34   :  { %307 = vmatpush3.msra.mxu1 %v159_v11 }
  0x35   :  { %308 = vmatprep.subr.mxu1 %v428_v0 }
  0x36   :  { %309 = vmatpush3.msra.mxu1 %v158_v12 }
  0x37   :  { %310 = vmatprep.subr.mxu1 %v428_v0 }
  0x38   :  { %311 = vmatpush3.msra.mxu1 %v157_v13 }
  0x39   :  { %312 = vmatprep.subr.mxu1 %v428_v0 }
  0x3a   :  { %313 = vmatpush3.msra.mxu1 %v156_v14 }
  0x3b   :  { %314 = vmatprep.subr.mxu1 %v428_v0 }
  0x3c   :  { %315 = vmatpush3.msra.mxu1 %v155_v15 }
  0x3d   :  { %316 = vmatprep.subr.mxu1 %v428_v0 }
  0x3e   :  { %317 = vmatpush3.msra.mxu1 %v154_v16 }
  0x3f   :  { %318 = vmatprep.subr.mxu1 %v428_v0 }
  0x40   :  { %319 = vmatpush3.msra.mxu1 %v153_v17 }
  0x41   :  { %320 = vmatprep.subr.mxu1 %v428_v0 }
  0x42   :  { %321 = vmatpush3.msra.mxu1 %v152_v18 }
  0x43   :  { %322 = vmatprep.subr.mxu1 %v428_v0 }
  0x44   :  { %323 = vmatpush3.msra.mxu1 %v151_v19 }
  0x45   :  { %324 = vmatprep.subr.mxu1 %v428_v0 }
  0x46   :  { %325 = vmatpush3.msra.mxu1 %v150_v20 }
  0xed   :  { %v145_v22 = vpop.f32.mrf.mxu0 }
  0xee   :  { %v146_v23 = vadd.f32 %v260_v21, %v145_v22 }
  0xef   :  { %v293_v24 = vpop.f32.mrf.mxu0 }
  0xf0   :  { %v149_v25 = vmax.f32 %v146_v23, 0.0 }
  0xf2   :  { %327 = vmatmul.mubr.f32.vlgmr.msra.gmra.mxu1 %v149_v25 }
 0x1b2   :  { %v239_v27 = vpop.f32.mrf.mxu1 }
 0x1b3   :  { %v240_v28 = vadd.f32 %v263_v26, %v239_v27 }
 0x1b4   :  { %v328_v29 = vpop.f32.mrf.mxu1 }
 0x1b5   :  { %243 = vst [vmem:[#allocation8] sm:$0xff] %v240_v28 }
 0x1b6   :  { %408 = shalt.err (!%p405_p5)
}
 0x1b7   :  { %253 = dma.vmem_to_hbm [thread:$0]  %s251_s12, 128, %s484_s5, [#allocation4]  }
 0x1b8   :  { %421 = dma.done.wait [#allocation4], 128  }
 0x1b9   :  { %422 = vsyncadd [#allocation4], 4294967168 }
 0x1ba   :  { %257 = vsyncpa [#allocation3], 1 }
 0x1bb   :  { %258 = vsyncpa [#allocation6], 1 }
 0x1bc   :  { %259 = vsyncpa [#allocation4], 1 }

</bundles_post_ra>
